<compile_context>
chip_gen: v7x
topology: tpu7x:2x2x1
jax: 0.10.0
libtpu: 0.0.40
codegen_flags: <defaults>
</compile_context>

<pallas_src>
import math

import jax
import jax.numpy as jnp
from jax.experimental import pallas as pl
from jax.experimental.pallas import tpu as pltpu

H1, H2, H3 = 64, 32, 16
LANE = 128  # MXU/VPU lane width


def _round_up(x, m):
    return (x + m - 1) // m * m


def mlp_kernel(x_ref,
               w1_ref, b1_ref,
               w2_ref, b2_ref,
               w3_ref, b3_ref,
               w4_ref, b4_ref,
               o_ref):
    out_dim = o_ref.shape[-1]

    # bf16 operands into the MXU, f32 accumulation (no-op if x is already bf16).
    x = x_ref[...].astype(jnp.bfloat16)

    # Layer 1: Linear + ReLU
    h = jnp.dot(x, w1_ref[...], preferred_element_type=jnp.float32) + b1_ref[...]
    h = jnp.maximum(h, 0.0)

    # Layer 2: Linear + ReLU
    h = jnp.dot(h.astype(jnp.bfloat16), w2_ref[...],
                preferred_element_type=jnp.float32) + b2_ref[...]
    h = jnp.maximum(h, 0.0)

    # Layer 3: Linear + ReLU
    h = jnp.dot(h.astype(jnp.bfloat16), w3_ref[...],
                preferred_element_type=jnp.float32) + b3_ref[...]
    h = jnp.maximum(h, 0.0)

    # Layer 4: MXU matmul against the lane-padded weights (VMEM-only padding),
    # then slice down to the real output columns BEFORE bias/sigmoid so the
    # EUP tanh runs on tb*out_dim elements and only out_dim columns are stored.
    h = jnp.dot(h.astype(jnp.bfloat16), w4_ref[...],
                preferred_element_type=jnp.float32)
    logits = h[:, :out_dim] + b4_ref[...]
    # Sigmoid via tanh so it stays on the EUP (free slot in this mem-bound kernel).
    o_ref[...] = 0.5 * (jnp.tanh(0.5 * logits) + 1.0)


def mlp_forward(x, params, *, block_batch=1024, core_parallel=False):
    (w1, b1), (w2, b2), (w3, b3), (w4, b4) = params
    batch, in_dim = x.shape
    out_dim = w4.shape[1]

    # Pad only the layer-4 WEIGHTS to a full 128-lane MXU tile (lives in VMEM
    # only).  The HBM output stays (batch_pad, out_dim) -> minimal writeback.
    out_pad = _round_up(max(out_dim, 1), LANE)
    w4p = jnp.zeros((w4.shape[0], out_pad), w4.dtype).at[:, :out_dim].set(w4)

    # One-time bf16 cast of the weights for the MXU (biases stay f32 and are
    # added to the f32 accumulator).
    w1c = w1.astype(jnp.bfloat16)
    w2c = w2.astype(jnp.bfloat16)
    w3c = w3.astype(jnp.bfloat16)
    w4c = w4p.astype(jnp.bfloat16)

    # Batch tile: multiple of 8 sublanes; 1024 rows by default.  VMEM use is a
    # few MiB per buffer even at tb=2048, so no vmem_limit_bytes override is
    # needed (set one only if block_batch is pushed past ~8K rows on v7x).
    tb = min(block_batch, _round_up(batch, 8))
    batch_pad = _round_up(batch, tb)
    if batch_pad != batch:
        x = jnp.pad(x, ((0, batch_pad - batch), (0, 0)))
    grid = (batch_pad // tb,)

    def const_spec(a):
        # Weight / bias tiles: same block every grid step -> stay VMEM-resident.
        return pl.BlockSpec(a.shape, lambda i: (0, 0))

    flops_per_row = 2 * (in_dim * H1 + H1 * H2 + H2 * H3 + H3 * out_pad)
    bytes_accessed = (
        batch_pad * in_dim * x.dtype.itemsize      # input tiles (dtype as given)
        + batch_pad * out_dim * 4                  # trimmed f32 output
        + sum(int(a.size) * a.dtype.itemsize
              for a in (w1c, b1, w2c, b2, w3c, b3, w4c, b4))
    )
    cost = pl.CostEstimate(
        flops=batch_pad * flops_per_row,
        transcendentals=batch_pad * out_dim,
        bytes_accessed=bytes_accessed,
    )

    # On v7x, core_parallel=True shards the batch loop across both TensorCores.
    sem = pltpu.CORE_PARALLEL if core_parallel else "parallel"

    out = pl.pallas_call(
        mlp_kernel,
        out_shape=jax.ShapeDtypeStruct((batch_pad, out_dim), jnp.float32),
        grid=grid,
        in_specs=[
            pl.BlockSpec((tb, in_dim), lambda i: (i, 0)),   # batch-tiled input
            const_spec(w1c), const_spec(b1),
            const_spec(w2c), const_spec(b2),
            const_spec(w3c), const_spec(b3),
            const_spec(w4c), const_spec(b4),
        ],
        # Block last dim equals the full array dim -> legal, and only the real
        # out_dim columns ever hit HBM.
        out_specs=pl.BlockSpec((tb, out_dim), lambda i: (i, 0)),
        compiler_params=pltpu.CompilerParams(
            dimension_semantics=(sem,),
        ),
        cost_estimate=cost,
    )(x, w1c, b1, w2c, b2, w3c, b3, w4c, b4)

    return out[:batch]


def init_linear(key, fan_in, fan_out):
    # PyTorch nn.Linear default init: U(-1/sqrt(fan_in), 1/sqrt(fan_in))
    kw, kb = jax.random.split(key)
    bound = 1.0 / math.sqrt(fan_in)
    w = jax.random.uniform(kw, (fan_in, fan_out), jnp.float32, -bound, bound)
    b = jax.random.uniform(kb, (1, fan_out), jnp.float32, -bound, bound)
    return w, b


def init_params(key, input_dim, output_dim):
    k1, k2, k3, k4 = jax.random.split(key, 4)
    return (
        init_linear(k1, input_dim, H1),
        init_linear(k2, H1, H2),
        init_linear(k3, H2, H3),
        init_linear(k4, H3, output_dim),
    )


if __name__ == "__main__":
    # Breast-cancer style shapes: 30 input features, 1 output (binary class).
    batch, input_dim, output_dim = 8, 30, 1

    key = jax.random.PRNGKey(0)
    kx, kp = jax.random.split(key)

    x = jax.random.normal(kx, (batch, input_dim), dtype=jnp.float32)
    params = init_params(kp, input_dim, output_dim)

    out = mlp_forward(x, params)
    out = jax.block_until_ready(out)

    # Sanity check vs. pure-JAX f32 reference (bf16 matmul inputs in the
    # kernel -> tolerance is relaxed accordingly).
    def ref_forward(x, params):
        (w1, b1), (w2, b2), (w3, b3), (w4, b4) = params
        h = jnp.maximum(x @ w1 + b1, 0.0)
        h = jnp.maximum(h @ w2 + b2, 0.0)
        h = jnp.maximum(h @ w3 + b3, 0.0)
        return jax.nn.sigmoid(h @ w4 + b4)

    ref = ref_forward(x, params)
    assert out.shape == (batch, output_dim)
    assert bool(jnp.all(jnp.isfinite(out)))
    assert bool(jnp.allclose(out, ref, atol=2e-2, rtol=2e-2)), (
        f"max abs diff {float(jnp.max(jnp.abs(out - ref)))}")

    print("KERNEL_OK")
</pallas_src>

<mosaic_0001>
module attributes {stable_mosaic.version = 11 : i64} {
  func.func @mlp_kernel(%arg0: i32, %arg1: memref<8x30xf32, #tpu.memory_space<vmem>>, %arg2: memref<30x64xbf16, #tpu.memory_space<vmem>>, %arg3: memref<1x64xf32, #tpu.memory_space<vmem>>, %arg4: memref<64x32xbf16, #tpu.memory_space<vmem>>, %arg5: memref<1x32xf32, #tpu.memory_space<vmem>>, %arg6: memref<32x16xbf16, #tpu.memory_space<vmem>>, %arg7: memref<1x16xf32, #tpu.memory_space<vmem>>, %arg8: memref<16x128xbf16, #tpu.memory_space<vmem>>, %arg9: memref<1x1xf32, #tpu.memory_space<vmem>>, %arg10: memref<8x1xf32, #tpu.memory_space<vmem>>) attributes {dimension_semantics = [#tpu.dimension_semantics<parallel>], iteration_bounds = array<i64: 1>, scalar_prefetch = 0 : i64, scratch_operands = 0 : i64, tpu.core_type = #tpu.core_type<tc>, window_params = [{transform_indices = @transform_0, window_bounds = array<i64: 8, 30>}, {pipeline_mode = #tpu.pipeline_mode<synchronous>, transform_indices = @transform_1, window_bounds = array<i64: 30, 64>}, {pipeline_mode = #tpu.pipeline_mode<synchronous>, transform_indices = @transform_2, window_bounds = array<i64: 1, 64>}, {pipeline_mode = #tpu.pipeline_mode<synchronous>, transform_indices = @transform_3, window_bounds = array<i64: 64, 32>}, {pipeline_mode = #tpu.pipeline_mode<synchronous>, transform_indices = @transform_4, window_bounds = array<i64: 1, 32>}, {pipeline_mode = #tpu.pipeline_mode<synchronous>, transform_indices = @transform_5, window_bounds = array<i64: 32, 16>}, {pipeline_mode = #tpu.pipeline_mode<synchronous>, transform_indices = @transform_6, window_bounds = array<i64: 1, 16>}, {pipeline_mode = #tpu.pipeline_mode<synchronous>, transform_indices = @transform_7, window_bounds = array<i64: 16, 128>}, {pipeline_mode = #tpu.pipeline_mode<synchronous>, transform_indices = @transform_8, window_bounds = array<i64: 1, 1>}, {transform_indices = @transform_9, window_bounds = array<i64: 8, 1>}]} {
    %c0 = arith.constant 0 : index
    %c0_0 = arith.constant 0 : index
    %0 = vector.load %arg1[%c0, %c0_0] : memref<8x30xf32, #tpu.memory_space<vmem>>, vector<8x30xf32>
    %1 = arith.truncf %0 : vector<8x30xf32> to vector<8x30xbf16>
    %c0_1 = arith.constant 0 : index
    %c0_2 = arith.constant 0 : index
    %2 = vector.load %arg2[%c0_1, %c0_2] : memref<30x64xbf16, #tpu.memory_space<vmem>>, vector<30x64xbf16>
    %cst = arith.constant dense<0.000000e+00> : vector<8x64xf32>
    %3 = tpu.matmul %1, %2, %cst {dimension_numbers = #tpu.dot_dimension_numbers<[1], [0], [0], [1], [0, 0, 1, 1], [], []>} : vector<8x30xbf16>, vector<30x64xbf16>, vector<8x64xf32> -> vector<8x64xf32>
    %c0_3 = arith.constant 0 : index
    %c0_4 = arith.constant 0 : index
    %4 = vector.load %arg3[%c0_3, %c0_4] : memref<1x64xf32, #tpu.memory_space<vmem>>, vector<1x64xf32>
    %5 = vector.broadcast %4 : vector<1x64xf32> to vector<8x64xf32>
    %6 = arith.addf %3, %5 : vector<8x64xf32>
    %cst_5 = arith.constant 0.000000e+00 : f32
    %7 = vector.broadcast %cst_5 : f32 to vector<8x64xf32>
    %8 = arith.maximumf %6, %7 : vector<8x64xf32>
    %9 = arith.truncf %8 : vector<8x64xf32> to vector<8x64xbf16>
    %c0_6 = arith.constant 0 : index
    %c0_7 = arith.constant 0 : index
    %10 = vector.load %arg4[%c0_6, %c0_7] : memref<64x32xbf16, #tpu.memory_space<vmem>>, vector<64x32xbf16>
    %cst_8 = arith.constant dense<0.000000e+00> : vector<8x32xf32>
    %11 = tpu.matmul %9, %10, %cst_8 {dimension_numbers = #tpu.dot_dimension_numbers<[1], [0], [0], [1], [0, 0, 1, 1], [], []>} : vector<8x64xbf16>, vector<64x32xbf16>, vector<8x32xf32> -> vector<8x32xf32>
    %c0_9 = arith.constant 0 : index
    %c0_10 = arith.constant 0 : index
    %12 = vector.load %arg5[%c0_9, %c0_10] : memref<1x32xf32, #tpu.memory_space<vmem>>, vector<1x32xf32>
    %13 = vector.broadcast %12 : vector<1x32xf32> to vector<8x32xf32>
    %14 = arith.addf %11, %13 : vector<8x32xf32>
    %cst_11 = arith.constant 0.000000e+00 : f32
    %15 = vector.broadcast %cst_11 : f32 to vector<8x32xf32>
    %16 = arith.maximumf %14, %15 : vector<8x32xf32>
    %17 = arith.truncf %16 : vector<8x32xf32> to vector<8x32xbf16>
    %c0_12 = arith.constant 0 : index
    %c0_13 = arith.constant 0 : index
    %18 = vector.load %arg6[%c0_12, %c0_13] : memref<32x16xbf16, #tpu.memory_space<vmem>>, vector<32x16xbf16>
    %cst_14 = arith.constant dense<0.000000e+00> : vector<8x16xf32>
    %19 = tpu.matmul %17, %18, %cst_14 {dimension_numbers = #tpu.dot_dimension_numbers<[1], [0], [0], [1], [0, 0, 1, 1], [], []>} : vector<8x32xbf16>, vector<32x16xbf16>, vector<8x16xf32> -> vector<8x16xf32>
    %c0_15 = arith.constant 0 : index
    %c0_16 = arith.constant 0 : index
    %20 = vector.load %arg7[%c0_15, %c0_16] : memref<1x16xf32, #tpu.memory_space<vmem>>, vector<1x16xf32>
    %21 = vector.broadcast %20 : vector<1x16xf32> to vector<8x16xf32>
    %22 = arith.addf %19, %21 : vector<8x16xf32>
    %cst_17 = arith.constant 0.000000e+00 : f32
    %23 = vector.broadcast %cst_17 : f32 to vector<8x16xf32>
    %24 = arith.maximumf %22, %23 : vector<8x16xf32>
    %25 = arith.truncf %24 : vector<8x16xf32> to vector<8x16xbf16>
    %c0_18 = arith.constant 0 : index
    %c0_19 = arith.constant 0 : index
    %26 = vector.load %arg8[%c0_18, %c0_19] : memref<16x128xbf16, #tpu.memory_space<vmem>>, vector<16x128xbf16>
    %cst_20 = arith.constant dense<0.000000e+00> : vector<8x128xf32>
    %27 = tpu.matmul %25, %26, %cst_20 {dimension_numbers = #tpu.dot_dimension_numbers<[1], [0], [0], [1], [0, 0, 1, 1], [], []>} : vector<8x16xbf16>, vector<16x128xbf16>, vector<8x128xf32> -> vector<8x128xf32>
    %28 = vector.extract_strided_slice %27 {offsets = [0, 0], sizes = [8, 1], strides = [1, 1]} : vector<8x128xf32> to vector<8x1xf32>
    %c0_21 = arith.constant 0 : index
    %c0_22 = arith.constant 0 : index
    %29 = vector.load %arg9[%c0_21, %c0_22] : memref<1x1xf32, #tpu.memory_space<vmem>>, vector<1x1xf32>
    %30 = vector.broadcast %29 : vector<1x1xf32> to vector<8x1xf32>
    %31 = arith.addf %28, %30 : vector<8x1xf32>
    %cst_23 = arith.constant 5.000000e-01 : f32
    %32 = vector.broadcast %cst_23 : f32 to vector<8x1xf32>
    %33 = arith.mulf %32, %31 : vector<8x1xf32>
    %34 = math.tanh %33 : vector<8x1xf32>
    %cst_24 = arith.constant 1.000000e+00 : f32
    %35 = vector.broadcast %cst_24 : f32 to vector<8x1xf32>
    %36 = arith.addf %34, %35 : vector<8x1xf32>
    %cst_25 = arith.constant 5.000000e-01 : f32
    %37 = vector.broadcast %cst_25 : f32 to vector<8x1xf32>
    %38 = arith.mulf %37, %36 : vector<8x1xf32>
    %c0_26 = arith.constant 0 : index
    %c0_27 = arith.constant 0 : index
    %39 = vector.load %arg10[%c0_26, %c0_27] : memref<8x1xf32, #tpu.memory_space<vmem>>, vector<8x1xf32>
    tpu.vector_store %arg10[%c0_26, %c0_27], %38 {strides = array<i32>} : memref<8x1xf32, #tpu.memory_space<vmem>>, vector<8x1xf32>,
    return
  }
  func.func @transform_0(%arg0: i32) -> (i32, i32) {
    %c0_i32 = arith.constant 0 : i32
    %c0_i32_0 = arith.constant 0 : i32
    return %arg0, %c0_i32 : i32, i32
  }
  func.func @transform_1(%arg0: i32) -> (i32, i32) {
    %c0_i32 = arith.constant 0 : i32
    %c0_i32_0 = arith.constant 0 : i32
    %c0_i32_1 = arith.constant 0 : i32
    return %c0_i32, %c0_i32_0 : i32, i32
  }
  func.func @transform_2(%arg0: i32) -> (i32, i32) {
    %c0_i32 = arith.constant 0 : i32
    %c0_i32_0 = arith.constant 0 : i32
    %c0_i32_1 = arith.constant 0 : i32
    return %c0_i32, %c0_i32_0 : i32, i32
  }
  func.func @transform_3(%arg0: i32) -> (i32, i32) {
    %c0_i32 = arith.constant 0 : i32
    %c0_i32_0 = arith.constant 0 : i32
    %c0_i32_1 = arith.constant 0 : i32
    return %c0_i32, %c0_i32_0 : i32, i32
  }
  func.func @transform_4(%arg0: i32) -> (i32, i32) {
    %c0_i32 = arith.constant 0 : i32
    %c0_i32_0 = arith.constant 0 : i32
    %c0_i32_1 = arith.constant 0 : i32
    return %c0_i32, %c0_i32_0 : i32, i32
  }
  func.func @transform_5(%arg0: i32) -> (i32, i32) {
    %c0_i32 = arith.constant 0 : i32
    %c0_i32_0 = arith.constant 0 : i32
    %c0_i32_1 = arith.constant 0 : i32
    return %c0_i32, %c0_i32_0 : i32, i32
  }
  func.func @transform_6(%arg0: i32) -> (i32, i32) {
    %c0_i32 = arith.constant 0 : i32
    %c0_i32_0 = arith.constant 0 : i32
    %c0_i32_1 = arith.constant 0 : i32
    return %c0_i32, %c0_i32_0 : i32, i32
  }
  func.func @transform_7(%arg0: i32) -> (i32, i32) {
    %c0_i32 = arith.constant 0 : i32
    %c0_i32_0 = arith.constant 0 : i32
    %c0_i32_1 = arith.constant 0 : i32
    return %c0_i32, %c0_i32_0 : i32, i32
  }
  func.func @transform_8(%arg0: i32) -> (i32, i32) {
    %c0_i32 = arith.constant 0 : i32
    %c0_i32_0 = arith.constant 0 : i32
    %c0_i32_1 = arith.constant 0 : i32
    return %c0_i32, %c0_i32_0 : i32, i32
  }
  func.func @transform_9(%arg0: i32) -> (i32, i32) {
    %c0_i32 = arith.constant 0 : i32
    %c0_i32_0 = arith.constant 0 : i32
    return %arg0, %c0_i32 : i32, i32
  }
}

</mosaic_0001>

<bundles_post_ra>
// kernel: tpu_custom_call.1
= control target key start
LH: loop header
LB: loop body
LE: loop exit
PB: predicated region body
PF: predicated region fallthrough
CT: control target
= control target key end

     0   :  { %v410_v0 = vmov 0.0   ;;  %vm63_vm0 = vcmask 1046528   ;;  %vm411_vm1 = vmmov 0   ;;  %vm59_vm2 = vcmask 244736   ;;  %s524_s1 = inlined_call_operand.vmem [shape: bf16[30,64], index: 1, kind: input, shape index: {}]   ;;  %s525_s0 = inlined_call_operand.vmem [shape: f32[8,30], index: 0, kind: input, shape index: {}]   ;;  %s526_s3 = inlined_call_operand.vmem [shape: bf16[64,32], index: 3, kind: input, shape index: {}]   ;;  %s527_s5 = inlined_call_operand.vmem [shape: bf16[32,16], index: 5, kind: input, shape index: {}]   ;;  %s528_s2 = inlined_call_operand.vmem [shape: f32[1,64], index: 2, kind: input, shape index: {}]   ;;  %s529_s7 = inlined_call_operand.vmem [shape: bf16[16,128], index: 7, kind: input, shape index: {}]   ;;  %s530_s4 = inlined_call_operand.vmem [shape: f32[1,32], index: 4, kind: input, shape index: {}]   ;;  %s531_s8 = inlined_call_operand.<no memory space> [shape: f32[1,1], index: 8, kind: input, shape index: {}]   ;;  %s532_s6 = inlined_call_operand.vmem [shape: f32[1,16], index: 6, kind: input, shape index: {}]   ;;  %s533_s9 = inlined_call_operand.vmem [shape: f32[8,1], index: 9, kind: output, shape index: {}]  }
   0x1   :  { %363 = vmatprep.subr.bf16.mxu0 %v410_v0  ;;  %v399_v1 = vld [vmem:[%s524_s1] sm:$0xff]   ;;  %367 = vmatprep.mubr.msk.bf16.mxu0 %vm411_vm1, %v410_v0  ;;  %v400_v2 = vld [vmem:[%s524_s1 + $0x8] sm:$0x7f]   ;;  %v403_v8 = vld [vmem:[%s526_s3 + $0x10] sm:$0xff]   ;;  %vm148_vm3 = vcmask 523264   ;;  %vm217_vm4 = vcmask 261120   ;;  %v14_v29 = vstv %s531_s8 }
   0x2   :  { %371 = vmatprep.subr.bf16.mxu1 %v410_v0  ;;  %379 = vmatprep.mubr.msk.bf16.mxu1 %vm411_vm1, %v410_v0  ;;  %v35_v3 = vld [vmem:[%s525_s0] sm:$0xff]  ;;  %v65_v4 = vsel %vm63_vm0, %v400_v2, 0  ;;  %v402_v6 = vld [vmem:[%s526_s3 + $0x8] sm:$0xff]   ;;  %v404_v9 = vld [vmem:[%s526_s3 + $0x18] sm:$0xff]   ;;  %15 = vst [vmem:[#allocation2] sm:$0x1] %v14_v29 }
   0x3   :  { %364 = vmatpush3.bf16.msra.mxu0 %v399_v1  ;;  %v401_v5 = vld [vmem:[%s526_s3] sm:$0xff]   ;;  %v36_v7 = vpack.c.bf16 %v35_v3, %v35_v3  ;;  %v406_v19 = vld [vmem:[%s527_s5 + $0x8] sm:$0xff]   ;;  %vm271_vm5 = vcmask 130048   ;;  %vm327_vm6 = vcmask 7168  }
   0x4   :  { %365 = vmatprep.subr.bf16.mxu0 %v410_v0  ;;  %372 = vmatpush3.bf16.msra.mxu1 %v401_v5  ;;  %v405_v10 = vld [vmem:[%s527_s5] sm:$0xff]  }
   0x5   :  { %373 = vmatprep.subr.bf16.mxu1 %v410_v0  ;;  %v333_v11 = vld [vmem:[%s528_s2] ss:$0 sm:$0xff] }
   0x6   :  { %v337_v20 = vld [vmem:[%s530_s4] ss:$0 sm:$0xff] }
   0x7   :  { %366 = vmatpush3.bf16.msra.mxu0 %v65_v4  ;;  %v407_v27 = vld [vmem:[%s529_s7] sm:$0xff]  }
   0x8   :  { %383 = vmatprep.subr.bf16.mxu0 %v410_v0  ;;  %374 = vmatpush3.bf16.msra.mxu1 %v402_v6  ;;  %v343_v30 = vld [vmem:[%s532_s6] ss:$0 sm:$0xff] }
   0x9   :  { %375 = vmatprep.subr.bf16.mxu1 %v410_v0  ;;  %v349_v38 = vld [vmem:[#allocation2] ss:$0 sm:$0xff] }
   0xa   :  { %368 = vmatmul.mubr.msk.bf16.vlgmr.msra.gmra.mrb[0].mxu0 %vm59_vm2, %v36_v7 }
   0xb   :  { %387 = vmatprep.mubr.msk.bf16.mxu0 %vm411_vm1, %v410_v0  ;;  %384 = vmatpush3.bf16.msra.mxu0 %v405_v10 }
   0xc   :  { %376 = vmatpush3.bf16.msra.mxu1 %v403_v8  ;;  %385 = vmatprep.subr.bf16.mxu0 %v410_v0 }
   0xd   :  { %377 = vmatprep.subr.bf16.mxu1 %v410_v0 }
   0xf   :  { %386 = vmatpush3.bf16.msra.mxu0 %v406_v19 }
  0x10   :  { %378 = vmatpush3.bf16.msra.mxu1 %v404_v9  ;;  %391 = vmatprep.subr.bf16.mxu0 %v410_v0 }
  0xdd   :  { %v101_v12 = vpop.f32.mrb[0].mxu0 }
  0xde   :  { %v102_v13 = vadd.f32 %v333_v11, %v101_v12  ;;  %v369_v14 = vpop.f32.mrb[1].mxu0 }
  0xdf   :  { %v104_v15 = vpop.f32.mrb[2].mxu0 }
  0xe0   :  { %v107_v16 = vmax.f32 %v102_v13, 0.0  ;;  %v370_v17 = vpop.f32.mrb[3].mxu0 }
  0xe2   :  { %v108_v18 = vpack.c.bf16 %v107_v16, %v107_v16 }
  0xe4   :  { %380 = vmatmul.mubr.msk.bf16.vlgmr.msra.gmra.mrb[0].mxu1 %vm148_vm3, %v108_v18 }
 0x1b7   :  { %v186_v21 = vpop.f32.mrb[0].mxu1 }
 0x1b8   :  { %v187_v22 = vadd.f32 %v337_v20, %v186_v21  ;;  %v381_v23 = vpop.f32.mrb[1].mxu1 }
 0x1b9   :  { %v189_v24 = vpop.f32.mrb[2].mxu1 }
 0x1ba   :  { %v192_v25 = vmax.f32 %v187_v22, 0.0  ;;  %v382_v26 = vpop.f32.mrb[3].mxu1 }
 0x1bc   :  { %v193_v28 = vpack.c.bf16 %v192_v25, %v192_v25 }
 0x1be   :  { %388 = vmatmul.mubr.msk.bf16.vlgmr.msra.gmra.mrb[4].mxu0 %vm217_vm4, %v193_v28 }
 0x1bf   :  { %392 = vmatpush3.bf16.msra.mxu0 %v407_v27  ;;  %393 = vmatprep.mubr.msk.bf16.mxu0 %vm411_vm1, %v410_v0 }
 0x291   :  { %v255_v31 = vpop.f32.mrb[4].mxu0 }
 0x292   :  { %v256_v32 = vadd.f32 %v343_v30, %v255_v31  ;;  %v389_v33 = vpop.f32.mrb[5].mxu0 }
 0x293   :  { %v258_v34 = vpop.f32.mrb[6].mxu0 }
 0x294   :  { %v261_v35 = vmax.f32 %v256_v32, 0.0  ;;  %v390_v36 = vpop.f32.mrb[7].mxu0 }
 0x296   :  { %v262_v37 = vpack.c.bf16 %v261_v35, %v261_v35 }
 0x298   :  { %394 = vmatmul.mubr.msk.bf16.vlgmr.msra.gmra.mrb[8].mxu0 %vm271_vm5, %v262_v37 }
 0x36b   :  { %v309_v39 = vpop.f32.mrb[8].mxu0 }
 0x36c   :  { %v322_v40 = vadd.f32 %v349_v38, %v309_v39  ;;  %v395_v41 = vpop.f32.mrb[9].mxu0 }
 0x36d   :  { %v312_v42 = vpop.f32.mrb[10].mxu0 }
 0x36e   :  { %v323_v43 = vmul.f32 0.5, %v322_v40  ;;  %v396_v44 = vpop.f32.mrb[11].mxu0 }
 0x370   :  { %408 = vtanh.f32 %v323_v43 }
 0x37a   :  { %v409_v45 = vpop.eup %408 }
 0x37b   :  { %v325_v46 = vadd.f32 1.0, %v409_v45 }
 0x37d   :  { %v326_v47 = vmul.f32 0.5, %v325_v46 }
 0x37f   :  { %328 = vst.msk [vmem:[%s533_s9] sm:$0xff] %vm327_vm6, %v326_v47 }

</bundles_post_ra>
